<compile_context>
chip_gen: v7x
topology: tpu7x:2x2x1
jax: 0.10.0
libtpu: 0.0.40
codegen_flags: <defaults>
</compile_context>

<pallas_src>
import functools

import numpy as np
import jax
import jax.numpy as jnp
from jax.experimental import pallas as pl
from jax.experimental.pallas import tpu as pltpu


PACK = 128   # logical rows packed per lane-dense packed row


def _get_int_dim_index(name):
    if isinstance(name, int):
        return name
    name_list = "axyz"
    assert name in name_list
    return name_list.index(name) - 1


def _block_budget_bytes():
    """Per-generation (input-block bytes, vmem_limit_bytes)."""
    try:
        kind = jax.devices()[0].device_kind.lower()
    except Exception:
        kind = ""
    if "v7" in kind:
        return 12 << 20, 48 << 20      # 64 MiB physical VMEM per TC: keep headroom
    if "v6" in kind:
        return 16 << 20, 64 << 20      # 128 MiB physical VMEM, ~1.4 TB/s HBM
    return 8 << 20, 32 << 20           # v5e & older/unknown: modest, safe footprint


def _length_kernel(x_ref, s_ref, o_ref):
    # x_ref: (TILE_B, D*PACK) row-interleaved block: lane l holds coordinate
    #        (l % D) of logical row (l // D).
    # s_ref: (D*PACK, PACK) resident selection matrix (bf16 coordinate counts).
    # o_ref: (TILE_B, PACK) lane-dense lengths.
    x = x_ref[...].astype(jnp.float32)
    sq = x * x
    # hi/lo bf16 split of the f32 squares -> two exact bf16 MXU passes with f32
    # accumulation (S entries are small exact integers), giving ~2^-16 relative
    # accuracy regardless of the backend's default f32 matmul precision.
    hi = sq.astype(jnp.bfloat16)
    lo = (sq - hi.astype(jnp.float32)).astype(jnp.bfloat16)
    s = s_ref[...]
    acc = jnp.dot(hi, s, preferred_element_type=jnp.float32)
    acc = acc + jnp.dot(lo, s, preferred_element_type=jnp.float32)
    o_ref[...] = jnp.sqrt(acc).astype(o_ref.dtype)


@functools.partial(jax.jit, static_argnames=("dims",))
def _length_forward(states, dims):
    orig_shape = states.shape
    d = orig_shape[-1]
    out_dtype = (states.dtype if jnp.issubdtype(states.dtype, jnp.floating)
                 else jnp.float32)

    x2d = states.reshape(-1, d)
    n = x2d.shape[0]

    nb = -(-n // PACK)
    nb = max(nb, 8)                 # keep matmul M-dim / sublanes friendly for tiny inputs
    n_pad = nb * PACK - n
    if n_pad:
        # Only materializes when N is not a multiple of 128 (contiguous pad
        # copy, no transpose).  When N % 128 == 0 the packing below is free.
        x2d = jnp.pad(x2d, ((0, n_pad), (0, 0)))

    # Row-interleaved lane-dense packing: metadata-only reshape, NO transpose.
    x_packed = x2d.reshape(nb, d * PACK)

    # Selection matrix: S[l, j] = (#times (l % d) appears in dims) if l//d == j
    # else 0.  Duplicate indices sum twice (torch x[:, [0, 0]] semantics);
    # empty dims -> all-zero S -> length 0.
    counts = np.zeros((d,), dtype=np.float32)
    for k in dims:
        counts[k] += 1.0
    lane = np.arange(d * PACK)
    sel_np = (lane // d)[:, None] == np.arange(PACK)[None, :]
    sel_np = sel_np.astype(np.float32) * counts[lane % d][:, None]
    sel = jnp.asarray(sel_np, dtype=jnp.bfloat16)

    block_bytes, vmem_limit = _block_budget_bytes()
    itemsize = x_packed.dtype.itemsize
    tile_b = block_bytes // (d * PACK * itemsize)
    if tile_b >= 256:
        tile_b = (tile_b // 256) * 256          # MXU/sublane friendly
    else:
        tile_b = max(8, (tile_b // 32) * 32)
    tile_b = max(8, min(tile_b, nb))
    grid = (pl.cdiv(nb, tile_b),)               # ragged last block handled by Pallas

    n_rows = nb * PACK
    cost = pl.CostEstimate(
        flops=int(4 * n_rows * d + 4 * n_rows * d * PACK),
        transcendentals=int(n_rows),
        bytes_accessed=int(n_rows * d * itemsize
                           + sel.size * sel.dtype.itemsize
                           + n_rows * jnp.dtype(out_dtype).itemsize),
    )

    out = pl.pallas_call(
        _length_kernel,
        out_shape=jax.ShapeDtypeStruct((nb, PACK), out_dtype),
        grid=grid,
        in_specs=[
            pl.BlockSpec((tile_b, d * PACK), lambda i: (i, 0)),
            pl.BlockSpec((d * PACK, PACK), lambda i: (0, 0)),   # resident every step
        ],
        out_specs=pl.BlockSpec((tile_b, PACK), lambda i: (i, 0)),
        compiler_params=pltpu.CompilerParams(
            dimension_semantics=("parallel",),   # lets v7x split rows over 2 TCs
            vmem_limit_bytes=vmem_limit,
        ),
        cost_estimate=cost,
    )(x_packed, sel)

    return out.reshape(-1)[:n].reshape(orig_shape[:-1] + (1,))


class Length:
    """JAX/Pallas port of toqnets Length."""

    def __init__(self, dim_index=-1):
        self.dim_index = dim_index

    def __call__(self, states, dim_index=None):
        if dim_index is None:
            dim_index = self.dim_index
        if isinstance(dim_index, int):
            dim_index = [dim_index]
        else:
            dim_index = [_get_int_dim_index(x) for x in dim_index]

        d = states.shape[-1]
        if -1 in dim_index:
            dims = tuple(range(d))                    # full L2 norm over last dim
        else:
            dims = tuple(k % d for k in dim_index)    # keep duplicates/order (torch)
        return _length_forward(states, dims=dims)


if __name__ == "__main__":
    key = jax.random.PRNGKey(0)
    # Typical toqnets layout: (batch=2, time=8, agents=4, coords=3).
    states = jax.random.normal(key, (2, 8, 4, 3), dtype=jnp.float32)

    length = Length(dim_index=-1)
    out = jax.block_until_ready(length(states))
    ref = jnp.sqrt(jnp.sum(states * states, axis=-1, keepdims=True))
    assert out.shape == states.shape[:-1] + (1,), out.shape
    assert jnp.allclose(out, ref, atol=1e-5, rtol=1e-4), "full-norm mismatch"

    # Coordinate-subset path ('xy' -> columns [0, 1]); exercises the selection matrix.
    out_xy = jax.block_until_ready(length(states, dim_index="xy"))
    ref_xy = jnp.sqrt(jnp.sum(states[..., :2] ** 2, axis=-1, keepdims=True))
    assert jnp.allclose(out_xy, ref_xy, atol=1e-5, rtol=1e-4), "xy mismatch"

    # Larger case: exercises row padding and the ragged handling.
    big = jax.random.normal(jax.random.PRNGKey(1), (30, 99, 131, 3), dtype=jnp.float32)
    out_big = jax.block_until_ready(length(big))
    ref_big = jnp.sqrt(jnp.sum(big * big, axis=-1, keepdims=True))
    assert out_big.shape == big.shape[:-1] + (1,), out_big.shape
    assert jnp.allclose(out_big, ref_big, atol=1e-5, rtol=1e-4), "big mismatch"

    print("KERNEL_OK")
</pallas_src>

<mosaic_0001>
module attributes {stable_mosaic.version = 11 : i64} {
  func.func @_length_kernel(%arg0: i32, %arg1: memref<8x384xf32, #tpu.memory_space<vmem>>, %arg2: memref<384x128xbf16, #tpu.memory_space<vmem>>, %arg3: memref<8x128xf32, #tpu.memory_space<vmem>>) attributes {dimension_semantics = [#tpu.dimension_semantics<parallel>], iteration_bounds = array<i64: 1>, scalar_prefetch = 0 : i64, scratch_operands = 0 : i64, tpu.core_type = #tpu.core_type<tc>, window_params = [{transform_indices = @transform_0, window_bounds = array<i64: 8, 384>}, {pipeline_mode = #tpu.pipeline_mode<synchronous>, transform_indices = @transform_1, window_bounds = array<i64: 384, 128>}, {transform_indices = @transform_2, window_bounds = array<i64: 8, 128>}]} {
    %c0 = arith.constant 0 : index
    %c0_0 = arith.constant 0 : index
    %0 = vector.load %arg1[%c0, %c0_0] : memref<8x384xf32, #tpu.memory_space<vmem>>, vector<8x384xf32>
    %1 = arith.mulf %0, %0 : vector<8x384xf32>
    %2 = arith.truncf %1 : vector<8x384xf32> to vector<8x384xbf16>
    %3 = arith.extf %2 : vector<8x384xbf16> to vector<8x384xf32>
    %4 = arith.subf %1, %3 : vector<8x384xf32>
    %5 = arith.truncf %4 : vector<8x384xf32> to vector<8x384xbf16>
    %c0_1 = arith.constant 0 : index
    %c0_2 = arith.constant 0 : index
    %6 = vector.load %arg2[%c0_1, %c0_2] : memref<384x128xbf16, #tpu.memory_space<vmem>>, vector<384x128xbf16>
    %cst = arith.constant dense<0.000000e+00> : vector<8x128xf32>
    %7 = tpu.matmul %2, %6, %cst {dimension_numbers = #tpu.dot_dimension_numbers<[1], [0], [0], [1], [0, 0, 1, 1], [], []>} : vector<8x384xbf16>, vector<384x128xbf16>, vector<8x128xf32> -> vector<8x128xf32>
    %cst_3 = arith.constant dense<0.000000e+00> : vector<8x128xf32>
    %8 = tpu.matmul %5, %6, %cst_3 {dimension_numbers = #tpu.dot_dimension_numbers<[1], [0], [0], [1], [0, 0, 1, 1], [], []>} : vector<8x384xbf16>, vector<384x128xbf16>, vector<8x128xf32> -> vector<8x128xf32>
    %9 = arith.addf %7, %8 : vector<8x128xf32>
    %10 = math.sqrt %9 : vector<8x128xf32>
    %c0_4 = arith.constant 0 : index
    %c0_5 = arith.constant 0 : index
    %11 = vector.load %arg3[%c0_4, %c0_5] : memref<8x128xf32, #tpu.memory_space<vmem>>, vector<8x128xf32>
    tpu.vector_store %arg3[%c0_4, %c0_5], %10 {strides = array<i32>} : memref<8x128xf32, #tpu.memory_space<vmem>>, vector<8x128xf32>,
    return
  }
  func.func @transform_0(%arg0: i32) -> (i32, i32) {
    %c0_i32 = arith.constant 0 : i32
    %c0_i32_0 = arith.constant 0 : i32
    return %arg0, %c0_i32 : i32, i32
  }
  func.func @transform_1(%arg0: i32) -> (i32, i32) {
    %c0_i32 = arith.constant 0 : i32
    %c0_i32_0 = arith.constant 0 : i32
    %c0_i32_1 = arith.constant 0 : i32
    return %c0_i32, %c0_i32_0 : i32, i32
  }
  func.func @transform_2(%arg0: i32) -> (i32, i32) {
    %c0_i32 = arith.constant 0 : i32
    %c0_i32_0 = arith.constant 0 : i32
    return %arg0, %c0_i32 : i32, i32
  }
}

</mosaic_0001>

<bundles_post_ra>
// kernel: _length_forward.1
= control target key start
LH: loop header
LB: loop body
LE: loop exit
PB: predicated region body
PF: predicated region fallthrough
CT: control target
= control target key end

     0   :  { %v554_v0 = vmov 0.0   ;;  %vm555_vm0 = vmmov 0   ;;  %s755_s1 = inlined_call_operand.vmem [shape: bf16[384,128], index: 1, kind: input, shape index: {}]   ;;  %s756_s0 = inlined_call_operand.vmem [shape: f32[8,384], index: 0, kind: input, shape index: {}]   ;;  %s757_s2 = inlined_call_operand.vmem [shape: f32[8,128], index: 2, kind: output, shape index: {}]  }
   0x1   :  { %480 = vmatprep.subr.bf16.mxu1 %v554_v0  ;;  %v575_v1 = vld [vmem:[%s755_s1 + $0x40] sm:$0xff]   ;;  %496 = vmatprep.mubr.msk.bf16.mxu1 %vm555_vm0, %v554_v0  ;;  %v594_v4 = vld [vmem:[%s755_s1 + $0x48] sm:$0xff]   ;;  %v612_v7 = vld [vmem:[%s755_s1 + $0x50] sm:$0xff]  }
   0x2   :  { %v582_v2 = vld [vmem:[%s755_s1 + $0x80] sm:$0xff]   ;;  %418 = vmatprep.subr.bf16.mxu0 %v575_v1  ;;  %v601_v5 = vld [vmem:[%s755_s1 + $0x88] sm:$0xff]   ;;  %v618_v8 = vld [vmem:[%s755_s1 + $0x90] sm:$0xff]  }
   0x3   :  { %v588_v3 = vld [vmem:[%s755_s1] sm:$0xff]   ;;  %481 = vmatpush3.bf16.msra.mxu1 %v582_v2  ;;  %v607_v6 = vld [vmem:[%s755_s1 + $0x8] sm:$0xff]   ;;  %v625_v9 = vld [vmem:[%s755_s1 + $0x10] sm:$0xff]  }
   0x4   :  { %419 = vmatpush3.bf16.msra.mxu0 %v588_v3  ;;  %482 = vmatprep.subr.bf16.mxu1 %v554_v0  ;;  %v631_v10 = vld [vmem:[%s755_s1 + $0x58] sm:$0xff]   ;;  %v650_v13 = vld [vmem:[%s755_s1 + $0x60] sm:$0xff]   ;;  %v669_v16 = vld [vmem:[%s755_s1 + $0x68] sm:$0xff]  }
   0x5   :  { %420 = vmatprep.subr.bf16.mxu0 %v594_v4  ;;  %v637_v11 = vld [vmem:[%s755_s1 + $0x98] sm:$0xff]   ;;  %v656_v14 = vld [vmem:[%s755_s1 + $0xa0] sm:$0xff]   ;;  %v675_v17 = vld [vmem:[%s755_s1 + $0xa8] sm:$0xff]  }
   0x6   :  { %v644_v12 = vld [vmem:[%s755_s1 + $0x18] sm:$0xff]   ;;  %v663_v15 = vld [vmem:[%s755_s1 + $0x20] sm:$0xff]   ;;  %v682_v18 = vld [vmem:[%s755_s1 + $0x28] sm:$0xff]  }
   0x7   :  { %483 = vmatpush3.bf16.msra.mxu1 %v601_v5  ;;  %v688_v19 = vld [vmem:[%s755_s1 + $0x70] sm:$0xff]   ;;  %v13_v22 = vld [vmem:[%s756_s0 + $0x8] sm:$0xff]  ;;  %v12_v23 = vld [vmem:[%s756_s0] sm:$0xff] }
   0x8   :  { %421 = vmatpush3.bf16.msra.mxu0 %v607_v6  ;;  %484 = vmatprep.subr.bf16.mxu1 %v554_v0  ;;  %v693_v20 = vld [vmem:[%s755_s1 + $0xb0] sm:$0xff]   ;;  %v549_v25 = vld [vmem:[%s755_s1 + $0x78] sm:$0xff]   ;;  %v16_v26 = vmul.f32 %v13_v22, %v13_v22  ;;  %v15_v27 = vmul.f32 %v12_v23, %v12_v23 }
   0x9   :  { %422 = vmatprep.subr.bf16.mxu0 %v612_v7  ;;  %v548_v21 = vld [vmem:[%s755_s1 + $0x30] sm:$0xff]   ;;  %v550_v29 = vld [vmem:[%s755_s1 + $0xb8] sm:$0xff]  }
   0xa   :  { %v14_v24 = vld [vmem:[%s756_s0 + $0x10] sm:$0xff]  ;;  %v19_v30 = vpack.c.bf16 %v16_v26, %v16_v26  ;;  %v18_v31 = vpack.c.bf16 %v15_v27, %v15_v27  ;;  %v551_v33 = vld [vmem:[%s755_s1 + $0x38] sm:$0xff]  }
   0xb   :  { %485 = vmatpush3.bf16.msra.mxu1 %v618_v8  ;;  %v17_v28 = vmul.f32 %v14_v24, %v14_v24 }
   0xc   :  { %423 = vmatpush3.bf16.msra.mxu0 %v625_v9  ;;  %486 = vmatprep.subr.bf16.mxu1 %v554_v0  ;;  %v22_v34 = vunpack.c.l.bf16 %v19_v30  ;;  %v21_v35 = vunpack.c.l.bf16 %v18_v31 }
   0xd   :  { %424 = vmatprep.subr.bf16.mxu0 %v631_v10  ;;  %v20_v32 = vpack.c.bf16 %v17_v28, %v17_v28 }
   0xe   :  { %v25_v37 = vsub.f32 %v16_v26, %v22_v34  ;;  %v24_v38 = vsub.f32 %v15_v27, %v21_v35 }
   0xf   :  { %487 = vmatpush3.bf16.msra.mxu1 %v637_v11  ;;  %v23_v36 = vunpack.c.l.bf16 %v20_v32 }
  0x10   :  { %425 = vmatpush3.bf16.msra.mxu0 %v644_v12  ;;  %488 = vmatprep.subr.bf16.mxu1 %v554_v0  ;;  %v28_v40 = vpack.c.bf16 %v25_v37, %v25_v37  ;;  %v27_v41 = vpack.c.bf16 %v24_v38, %v24_v38 }
  0x11   :  { %426 = vmatprep.subr.bf16.mxu0 %v650_v13  ;;  %v26_v39 = vsub.f32 %v17_v28, %v23_v36 }
  0x12   :  { %254 = vmatprep.mubr.bf16.mxu0 %v28_v40 }
  0x13   :  { %489 = vmatpush3.bf16.msra.mxu1 %v656_v14  ;;  %v29_v42 = vpack.c.bf16 %v26_v39, %v26_v39 }
  0x14   :  { %427 = vmatpush3.bf16.msra.mxu0 %v663_v15  ;;  %490 = vmatprep.subr.bf16.mxu1 %v554_v0 }
  0x15   :  { %428 = vmatprep.subr.bf16.mxu0 %v669_v16 }
  0x17   :  { %491 = vmatpush3.bf16.msra.mxu1 %v675_v17 }
  0x18   :  { %429 = vmatpush3.bf16.msra.mxu0 %v682_v18  ;;  %492 = vmatprep.subr.bf16.mxu1 %v554_v0 }
  0x19   :  { %430 = vmatprep.subr.bf16.mxu0 %v688_v19 }
  0x1b   :  { %493 = vmatpush3.bf16.msra.mxu1 %v693_v20 }
  0x1c   :  { %431 = vmatpush3.bf16.msra.mxu0 %v548_v21  ;;  %494 = vmatprep.subr.bf16.mxu1 %v554_v0 }
  0x1d   :  { %432 = vmatprep.subr.bf16.mxu0 %v549_v25 }
  0x1f   :  { %495 = vmatpush3.bf16.msra.mxu1 %v550_v29 }
  0x20   :  { %433 = vmatpush3.bf16.msra.mxu0 %v551_v33  ;;  %500 = vmatprep.subr.bf16.mxu1 %v554_v0 }
  0x21   :  { %449 = vmatprep.subr.bf16.mxu0 %v575_v1 }
  0x22   :  { %497 = vmatmul.mubr.bf16.vlgmr.msra.gmra.mrb[0].mxu1 %v29_v42 }
  0x23   :  { %255 = vmatmul.mubr.bf16.vlgmr.msra.gmra.mrb[0].mxu0 %v27_v41  ;;  %501 = vmatpush3.bf16.msra.mxu1 %v582_v2 }
  0x24   :  { %450 = vmatpush3.bf16.msra.mxu0 %v588_v3  ;;  %502 = vmatprep.subr.bf16.mxu1 %v554_v0 }
  0x25   :  { %451 = vmatprep.subr.bf16.mxu0 %v594_v4  ;;  %516 = vmatprep.mubr.msk.bf16.mxu1 %vm555_vm0, %v554_v0 }
  0x26   :  { %334 = vmatprep.mubr.bf16.mxu0 %v19_v30 }
  0x27   :  { %503 = vmatpush3.bf16.msra.mxu1 %v601_v5 }
  0x28   :  { %452 = vmatpush3.bf16.msra.mxu0 %v607_v6  ;;  %504 = vmatprep.subr.bf16.mxu1 %v554_v0 }
  0x29   :  { %453 = vmatprep.subr.bf16.mxu0 %v612_v7 }
  0x2b   :  { %505 = vmatpush3.bf16.msra.mxu1 %v618_v8 }
  0x2c   :  { %454 = vmatpush3.bf16.msra.mxu0 %v625_v9  ;;  %506 = vmatprep.subr.bf16.mxu1 %v554_v0 }
  0x2d   :  { %455 = vmatprep.subr.bf16.mxu0 %v631_v10 }
  0x2f   :  { %507 = vmatpush3.bf16.msra.mxu1 %v637_v11 }
  0x30   :  { %456 = vmatpush3.bf16.msra.mxu0 %v644_v12  ;;  %508 = vmatprep.subr.bf16.mxu1 %v554_v0 }
  0x31   :  { %457 = vmatprep.subr.bf16.mxu0 %v650_v13 }
  0x33   :  { %509 = vmatpush3.bf16.msra.mxu1 %v656_v14 }
  0x34   :  { %458 = vmatpush3.bf16.msra.mxu0 %v663_v15  ;;  %510 = vmatprep.subr.bf16.mxu1 %v554_v0 }
  0x35   :  { %459 = vmatprep.subr.bf16.mxu0 %v669_v16 }
  0x37   :  { %511 = vmatpush3.bf16.msra.mxu1 %v675_v17 }
  0x38   :  { %460 = vmatpush3.bf16.msra.mxu0 %v682_v18  ;;  %512 = vmatprep.subr.bf16.mxu1 %v554_v0 }
  0x39   :  { %461 = vmatprep.subr.bf16.mxu0 %v688_v19 }
  0x3b   :  { %513 = vmatpush3.bf16.msra.mxu1 %v693_v20 }
  0x3c   :  { %462 = vmatpush3.bf16.msra.mxu0 %v548_v21  ;;  %514 = vmatprep.subr.bf16.mxu1 %v554_v0 }
  0x3d   :  { %463 = vmatprep.subr.bf16.mxu0 %v549_v25 }
  0x3f   :  { %515 = vmatpush3.bf16.msra.mxu1 %v550_v29 }
  0x40   :  { %464 = vmatpush3.bf16.msra.mxu0 %v551_v33 }
  0x42   :  { %517 = vmatmul.mubr.bf16.vlgmr.msra.gmra.mrb[0].mxu1 %v20_v32 }
  0x43   :  { %335 = vmatmul.mubr.bf16.vlgmr.msra.gmra.mrb[4].mxu0 %v18_v31 }
  0xf6   :  { %v434_v43 = vpop.f32.mrb[0].mxu0 }
  0xf7   :  { %v435_v44 = vpop.f32.mrb[1].mxu0 }
  0xf8   :  { %v436_v45 = vadd.f32 %v435_v44, %v434_v43  ;;  %v437_v46 = vpop.f32.mrb[2].mxu0 }
  0xf9   :  { %v438_v47 = vpop.f32.mrb[3].mxu0 }
 0x115   :  { %v376_v48 = vpop.f32.mrb[0].mxu1 }
 0x116   :  { %v465_v49 = vpop.f32.mrb[4].mxu0  ;;  %v518_v50 = vpop.f32.mrb[1].mxu1 }
 0x117   :  { %v466_v51 = vpop.f32.mrb[5].mxu0  ;;  %v379_v52 = vpop.f32.mrb[2].mxu1 }
 0x118   :  { %v467_v53 = vadd.f32 %v466_v51, %v465_v49  ;;  %v468_v54 = vpop.f32.mrb[6].mxu0  ;;  %v519_v55 = vpop.f32.mrb[3].mxu1 }
 0x119   :  { %v469_v56 = vpop.f32.mrb[7].mxu0 }
 0x11a   :  { %v520_v57 = vadd.f32 %v467_v53, %v436_v45 }
 0x11c   :  { %v521_v58 = vadd.f32 %v520_v57, %v376_v48 }
 0x11e   :  { %552 = vrsqrt.f32 %v521_v58  ;;  %vm384_vm1 = vcmp.eq.f32.partialorder %v521_v58, inf  ;;  %v387_v61 = vand.u32 2147483648, %v521_v58  ;;  %vm386_vm2 = vcmp.eq.f32.partialorder %v521_v58, 0.0 }
 0x128   :  { %v553_v59 = vpop.eup %552 }
 0x129   :  { %v383_v60 = vmul.f32 %v553_v59, %v521_v58 }
 0x12b   :  { %v385_v62 = vsel %vm384_vm1, %v521_v58, %v383_v60 }
 0x12c   :  { %v388_v63 = vsel %vm386_vm2, %v387_v61, %v385_v62 }
 0x12d   :  { %389 = vst [vmem:[%s757_s2] sm:$0xff] %v388_v63 }

</bundles_post_ra>
